<compile_context>
chip_gen: v7x
topology: tpu7x:2x2x1
jax: 0.10.0
libtpu: 0.0.40
codegen_flags: <defaults>
</compile_context>

<pallas_src>
import functools

import jax
import jax.numpy as jnp
from jax import lax
from jax.experimental import pallas as pl
from jax.experimental.pallas import tpu as pltpu


def _euler_ode_kernel(x_ref, w_ref, b_ref, out_ref, *, n_steps, h):
    """One grid step = full Euler integration for one batch tile."""
    x0 = x_ref[...].astype(jnp.float32)        # (TB, H) f32 Euler state
    w = w_ref[...]                             # (H, H)  bf16, already W^T
    b = b_ref[...].astype(jnp.float32)         # (1, H)  f32 — splat per add,
                                               # never materialized at (TB, H)

    def body(_, x):
        # bf16 x bf16 MXU matmul, f32 accumulate; tanh/FMA stay f32 (v5e-safe).
        y = jnp.dot(x.astype(jnp.bfloat16), w,
                    preferred_element_type=jnp.float32) + b
        return x + h * jnp.tanh(y)             # MXU -> EUP tanh -> VPU FMA

    # The recurrence is serial in x; cap the unroll (no cross-step overlap
    # exists to be won), just enough to hide per-iteration loop overhead.
    x_final = lax.fori_loop(0, n_steps, body, x0, unroll=min(n_steps, 8))
    out_ref[...] = x_final.astype(out_ref.dtype)


def euler_forward_ode_net(x0, t0, t1, weight, bias, n_steps, *, block_b=None):
    """Pallas wrapper.

    x0:     (B, H) float32   (buffer is donated to the output!)
    t0, t1: static Python scalars
    weight: (H, H) float32 — PyTorch nn.Linear weight (out, in)
    bias:   (H,)   float32
    """
    B, H = x0.shape
    n_steps = int(n_steps)
    assert n_steps >= 1, "Euler_Forward_ODE_Net requires N >= 1"
    h = float(t1 - t0) / n_steps                    # compile-time constant

    w_t = weight.T.astype(jnp.bfloat16)             # (H_in, H_out), MXU-native
    b2d = bias.reshape(1, H).astype(jnp.float32)

    if block_b is None:
        # <=128 rows keeps the per-step f32 live set inside the vreg file;
        # B > 128 also gives >= 2 grid steps so the "parallel" batch axis
        # shards across both TensorCores on v7x.
        block_b = B if B <= 128 else 128

    kernel = functools.partial(_euler_ode_kernel, n_steps=n_steps, h=h)

    cost = pl.CostEstimate(
        flops=2 * B * H * H * n_steps,
        transcendentals=B * H * n_steps,
        bytes_accessed=2 * B * H * 4 + H * H * 2 + H * 4,
    )

    return pl.pallas_call(
        kernel,
        out_shape=jax.ShapeDtypeStruct((B, H), x0.dtype),
        grid_spec=pltpu.PrefetchScalarGridSpec(
            num_scalar_prefetch=0,
            grid=(pl.cdiv(B, block_b),),
            in_specs=[
                pl.BlockSpec((block_b, H), lambda i: (i, 0)),   # x0 tile
                pl.BlockSpec((H, H), lambda i: (0, 0)),         # W^T (invariant)
                pl.BlockSpec((1, H), lambda i: (0, 0)),         # bias (invariant)
            ],
            out_specs=pl.BlockSpec((block_b, H), lambda i: (i, 0)),
        ),
        compiler_params=pltpu.CompilerParams(
            dimension_semantics=("parallel",),
            vmem_limit_bytes=32 * 1024 * 1024,
        ),
        cost_estimate=cost,
        input_output_aliases={0: 0},                # donate x0's buffer
    )(x0, w_t, b2d)

    # Note: when B is not a multiple of block_b, the last tile reads padded
    # rows (garbage). Harmless: tanh is bounded and padded rows are never
    # written back — do not "fix" this into a masked path.


def euler_forward_ode_net_ref(x0, t0, t1, weight, bias, n_steps):
    """Pure-JAX f32 reference mirroring the PyTorch forward."""
    h = (t1 - t0) / n_steps
    x = x0
    for _ in range(n_steps):
        x = x + h * jnp.tanh(x @ weight.T + bias)
    return x


if __name__ == "__main__":
    # Small shapes consistent with the module: hidden_layer_size=128, N=8 steps.
    B = 8        # batch
    H = 128      # hidden_layer_size
    N = 8        # number of Euler steps

    key = jax.random.PRNGKey(0)
    kx, kw, kb = jax.random.split(key, 3)

    x0 = jax.random.normal(kx, (B, H), dtype=jnp.float32)
    # Deterministic parameter init (uniform, a la nn.Linear default scale).
    bound = 1.0 / (H ** 0.5)
    weight = jax.random.uniform(kw, (H, H), minval=-bound, maxval=bound,
                                dtype=jnp.float32)
    bias = jax.random.uniform(kb, (H,), minval=-bound, maxval=bound,
                              dtype=jnp.float32)

    t0, t1 = 0.0, 1.0

    # Reference first (the pallas_call donates x0's buffer via aliasing).
    ref = euler_forward_ode_net_ref(x0, t0, t1, weight, bias, N)

    out = euler_forward_ode_net(x0, t0, t1, weight, bias, N)
    out = jax.block_until_ready(out)

    assert out.shape == (B, H)
    # bf16 MXU operands vs. an f32 reference -> loosened tolerance.
    assert jnp.allclose(out, ref, atol=3e-2, rtol=3e-2), "mismatch vs reference"

    print("KERNEL_OK")
</pallas_src>

<mosaic_0001>
module attributes {stable_mosaic.version = 11 : i64} {
  func.func @_euler_ode_kernel(%arg0: i32, %arg1: memref<8x128xf32, #tpu.memory_space<vmem>>, %arg2: memref<128x128xbf16, #tpu.memory_space<vmem>>, %arg3: memref<1x128xf32, #tpu.memory_space<vmem>>, %arg4: memref<8x128xf32, #tpu.memory_space<vmem>>) attributes {dimension_semantics = [#tpu.dimension_semantics<parallel>], iteration_bounds = array<i64: 1>, scalar_prefetch = 0 : i64, scratch_operands = 0 : i64, tpu.core_type = #tpu.core_type<tc>, window_params = [{transform_indices = @transform_0, window_bounds = array<i64: 8, 128>}, {pipeline_mode = #tpu.pipeline_mode<synchronous>, transform_indices = @transform_1, window_bounds = array<i64: 128, 128>}, {pipeline_mode = #tpu.pipeline_mode<synchronous>, transform_indices = @transform_2, window_bounds = array<i64: 1, 128>}, {transform_indices = @transform_3, window_bounds = array<i64: 8, 128>}]} {
    %c0 = arith.constant 0 : index
    %c0_0 = arith.constant 0 : index
    %0 = vector.load %arg1[%c0, %c0_0] : memref<8x128xf32, #tpu.memory_space<vmem>>, vector<8x128xf32>
    %c0_1 = arith.constant 0 : index
    %c0_2 = arith.constant 0 : index
    %1 = vector.load %arg2[%c0_1, %c0_2] : memref<128x128xbf16, #tpu.memory_space<vmem>>, vector<128x128xbf16>
    %c0_3 = arith.constant 0 : index
    %c0_4 = arith.constant 0 : index
    %2 = vector.load %arg3[%c0_3, %c0_4] : memref<1x128xf32, #tpu.memory_space<vmem>>, vector<1x128xf32>
    %c0_i32 = arith.constant 0 : i32
    %3 = arith.truncf %0 : vector<8x128xf32> to vector<8x128xbf16>
    %cst = arith.constant dense<0.000000e+00> : vector<8x128xf32>
    %4 = tpu.matmul %3, %1, %cst {dimension_numbers = #tpu.dot_dimension_numbers<[1], [0], [0], [1], [0, 0, 1, 1], [], []>} : vector<8x128xbf16>, vector<128x128xbf16>, vector<8x128xf32> -> vector<8x128xf32>
    %5 = vector.broadcast %2 : vector<1x128xf32> to vector<8x128xf32>
    %6 = arith.addf %4, %5 : vector<8x128xf32>
    %7 = math.tanh %6 : vector<8x128xf32>
    %cst_5 = arith.constant 1.250000e-01 : f32
    %8 = vector.broadcast %cst_5 : f32 to vector<8x128xf32>
    %9 = arith.mulf %8, %7 : vector<8x128xf32>
    %10 = arith.addf %0, %9 : vector<8x128xf32>
    %c1_i32 = arith.constant 1 : i32
    %11 = arith.truncf %10 : vector<8x128xf32> to vector<8x128xbf16>
    %cst_6 = arith.constant dense<0.000000e+00> : vector<8x128xf32>
    %12 = tpu.matmul %11, %1, %cst_6 {dimension_numbers = #tpu.dot_dimension_numbers<[1], [0], [0], [1], [0, 0, 1, 1], [], []>} : vector<8x128xbf16>, vector<128x128xbf16>, vector<8x128xf32> -> vector<8x128xf32>
    %13 = vector.broadcast %2 : vector<1x128xf32> to vector<8x128xf32>
    %14 = arith.addf %12, %13 : vector<8x128xf32>
    %15 = math.tanh %14 : vector<8x128xf32>
    %cst_7 = arith.constant 1.250000e-01 : f32
    %16 = vector.broadcast %cst_7 : f32 to vector<8x128xf32>
    %17 = arith.mulf %16, %15 : vector<8x128xf32>
    %18 = arith.addf %10, %17 : vector<8x128xf32>
    %c2_i32 = arith.constant 2 : i32
    %19 = arith.truncf %18 : vector<8x128xf32> to vector<8x128xbf16>
    %cst_8 = arith.constant dense<0.000000e+00> : vector<8x128xf32>
    %20 = tpu.matmul %19, %1, %cst_8 {dimension_numbers = #tpu.dot_dimension_numbers<[1], [0], [0], [1], [0, 0, 1, 1], [], []>} : vector<8x128xbf16>, vector<128x128xbf16>, vector<8x128xf32> -> vector<8x128xf32>
    %21 = vector.broadcast %2 : vector<1x128xf32> to vector<8x128xf32>
    %22 = arith.addf %20, %21 : vector<8x128xf32>
    %23 = math.tanh %22 : vector<8x128xf32>
    %cst_9 = arith.constant 1.250000e-01 : f32
    %24 = vector.broadcast %cst_9 : f32 to vector<8x128xf32>
    %25 = arith.mulf %24, %23 : vector<8x128xf32>
    %26 = arith.addf %18, %25 : vector<8x128xf32>
    %c3_i32 = arith.constant 3 : i32
    %27 = arith.truncf %26 : vector<8x128xf32> to vector<8x128xbf16>
    %cst_10 = arith.constant dense<0.000000e+00> : vector<8x128xf32>
    %28 = tpu.matmul %27, %1, %cst_10 {dimension_numbers = #tpu.dot_dimension_numbers<[1], [0], [0], [1], [0, 0, 1, 1], [], []>} : vector<8x128xbf16>, vector<128x128xbf16>, vector<8x128xf32> -> vector<8x128xf32>
    %29 = vector.broadcast %2 : vector<1x128xf32> to vector<8x128xf32>
    %30 = arith.addf %28, %29 : vector<8x128xf32>
    %31 = math.tanh %30 : vector<8x128xf32>
    %cst_11 = arith.constant 1.250000e-01 : f32
    %32 = vector.broadcast %cst_11 : f32 to vector<8x128xf32>
    %33 = arith.mulf %32, %31 : vector<8x128xf32>
    %34 = arith.addf %26, %33 : vector<8x128xf32>
    %c4_i32 = arith.constant 4 : i32
    %35 = arith.truncf %34 : vector<8x128xf32> to vector<8x128xbf16>
    %cst_12 = arith.constant dense<0.000000e+00> : vector<8x128xf32>
    %36 = tpu.matmul %35, %1, %cst_12 {dimension_numbers = #tpu.dot_dimension_numbers<[1], [0], [0], [1], [0, 0, 1, 1], [], []>} : vector<8x128xbf16>, vector<128x128xbf16>, vector<8x128xf32> -> vector<8x128xf32>
    %37 = vector.broadcast %2 : vector<1x128xf32> to vector<8x128xf32>
    %38 = arith.addf %36, %37 : vector<8x128xf32>
    %39 = math.tanh %38 : vector<8x128xf32>
    %cst_13 = arith.constant 1.250000e-01 : f32
    %40 = vector.broadcast %cst_13 : f32 to vector<8x128xf32>
    %41 = arith.mulf %40, %39 : vector<8x128xf32>
    %42 = arith.addf %34, %41 : vector<8x128xf32>
    %c5_i32 = arith.constant 5 : i32
    %43 = arith.truncf %42 : vector<8x128xf32> to vector<8x128xbf16>
    %cst_14 = arith.constant dense<0.000000e+00> : vector<8x128xf32>
    %44 = tpu.matmul %43, %1, %cst_14 {dimension_numbers = #tpu.dot_dimension_numbers<[1], [0], [0], [1], [0, 0, 1, 1], [], []>} : vector<8x128xbf16>, vector<128x128xbf16>, vector<8x128xf32> -> vector<8x128xf32>
    %45 = vector.broadcast %2 : vector<1x128xf32> to vector<8x128xf32>
    %46 = arith.addf %44, %45 : vector<8x128xf32>
    %47 = math.tanh %46 : vector<8x128xf32>
    %cst_15 = arith.constant 1.250000e-01 : f32
    %48 = vector.broadcast %cst_15 : f32 to vector<8x128xf32>
    %49 = arith.mulf %48, %47 : vector<8x128xf32>
    %50 = arith.addf %42, %49 : vector<8x128xf32>
    %c6_i32 = arith.constant 6 : i32
    %51 = arith.truncf %50 : vector<8x128xf32> to vector<8x128xbf16>
    %cst_16 = arith.constant dense<0.000000e+00> : vector<8x128xf32>
    %52 = tpu.matmul %51, %1, %cst_16 {dimension_numbers = #tpu.dot_dimension_numbers<[1], [0], [0], [1], [0, 0, 1, 1], [], []>} : vector<8x128xbf16>, vector<128x128xbf16>, vector<8x128xf32> -> vector<8x128xf32>
    %53 = vector.broadcast %2 : vector<1x128xf32> to vector<8x128xf32>
    %54 = arith.addf %52, %53 : vector<8x128xf32>
    %55 = math.tanh %54 : vector<8x128xf32>
    %cst_17 = arith.constant 1.250000e-01 : f32
    %56 = vector.broadcast %cst_17 : f32 to vector<8x128xf32>
    %57 = arith.mulf %56, %55 : vector<8x128xf32>
    %58 = arith.addf %50, %57 : vector<8x128xf32>
    %c7_i32 = arith.constant 7 : i32
    %59 = arith.truncf %58 : vector<8x128xf32> to vector<8x128xbf16>
    %cst_18 = arith.constant dense<0.000000e+00> : vector<8x128xf32>
    %60 = tpu.matmul %59, %1, %cst_18 {dimension_numbers = #tpu.dot_dimension_numbers<[1], [0], [0], [1], [0, 0, 1, 1], [], []>} : vector<8x128xbf16>, vector<128x128xbf16>, vector<8x128xf32> -> vector<8x128xf32>
    %61 = vector.broadcast %2 : vector<1x128xf32> to vector<8x128xf32>
    %62 = arith.addf %60, %61 : vector<8x128xf32>
    %63 = math.tanh %62 : vector<8x128xf32>
    %cst_19 = arith.constant 1.250000e-01 : f32
    %64 = vector.broadcast %cst_19 : f32 to vector<8x128xf32>
    %65 = arith.mulf %64, %63 : vector<8x128xf32>
    %66 = arith.addf %58, %65 : vector<8x128xf32>
    %c0_20 = arith.constant 0 : index
    %c0_21 = arith.constant 0 : index
    %67 = vector.load %arg4[%c0_20, %c0_21] : memref<8x128xf32, #tpu.memory_space<vmem>>, vector<8x128xf32>
    tpu.vector_store %arg4[%c0_20, %c0_21], %66 {strides = array<i32>} : memref<8x128xf32, #tpu.memory_space<vmem>>, vector<8x128xf32>,
    return
  }
  func.func @transform_0(%arg0: i32) -> (i32, i32) {
    %c0_i32 = arith.constant 0 : i32
    %c0_i32_0 = arith.constant 0 : i32
    return %arg0, %c0_i32 : i32, i32
  }
  func.func @transform_1(%arg0: i32) -> (i32, i32) {
    %c0_i32 = arith.constant 0 : i32
    %c0_i32_0 = arith.constant 0 : i32
    %c0_i32_1 = arith.constant 0 : i32
    return %c0_i32, %c0_i32_0 : i32, i32
  }
  func.func @transform_2(%arg0: i32) -> (i32, i32) {
    %c0_i32 = arith.constant 0 : i32
    %c0_i32_0 = arith.constant 0 : i32
    %c0_i32_1 = arith.constant 0 : i32
    return %c0_i32, %c0_i32_0 : i32, i32
  }
  func.func @transform_3(%arg0: i32) -> (i32, i32) {
    %c0_i32 = arith.constant 0 : i32
    %c0_i32_0 = arith.constant 0 : i32
    return %arg0, %c0_i32 : i32, i32
  }
}

</mosaic_0001>

<bundles_post_ra>
// kernel: tpu_custom_call.1
= control target key start
LH: loop header
LB: loop body
LE: loop exit
PB: predicated region body
PF: predicated region fallthrough
CT: control target
= control target key end

     0   :  { %8 = vsyncpa [#allocation3], 0  ;;  %s1070_s0 = inlined_call_operand.hbm [shape: f32[8,128], index: 0, kind: input, shape index: {}, may-alias: {0,3}]   ;;  %s1071_s1 = inlined_call_operand.hbm [shape: bf16[128,128], index: 1, kind: input, shape index: {}]   ;;  %s1072_s2 = inlined_call_operand.vmem [shape: f32[1,128], index: 2, kind: input, shape index: {}]   ;;  %s1073_s3 = inlined_call_operand.hbm [shape: f32[8,128], index: 3, kind: output, shape index: {}, may-alias: {0,3}]  }
   0x1   :  { %9 = vsyncpa [#allocation6], 0 }
   0x2   :  { %10 = vsyncpa [#allocation4], 0  ;;  %s827_s12 = smov [#allocation2]   ;;  %s828_s14 = smov [#allocation5]  }
   0x3   :  { %s17_s13 = sshll.u32 %s827_s12, 4  ;;  %s26_s15 = sshll.u32 %s828_s14, 4  ;;  %s18_s13 = int_to_ptr.vmem [resolvable:$true] %s17_s13  ;;  %s854_s15 = int_to_ptr.vmem [resolvable:$true] %s26_s15 }
   0x4   :  { %s755_s18 = scalar_lea.hbm %s1070_s0, 128 }
   0x5   :  { %p756_p0 = scmp.ne.s32.totalorder %s1070_s0, %s755_s18  ;;  %p759_p1 = scmp.lt.u32.totalorder %s755_s18, %s1070_s0 }
   0x7   :  { %p761_p2 = pnand %p759_p1, %p756_p0 }
   0x9   :  { %764 = shalt.err (!%p761_p2)
}
   0xa   :  { %s765_s23 = scalar_lea.vmem %s18_s13, 128  ;;  %p770_p4 = scmp.lt.s32.totalorder %s18_s13, %s18_s13 }
   0xb   :  { %p766_p3 = scmp.ne.s32.totalorder %s18_s13, %s765_s23  ;;  %p771_p5 = scmp.lt.s32.totalorder %s765_s23, %s765_s23 }
   0xd   :  { %p772_p6 = por %p771_p5, %p770_p4 }
   0xf   :  { %p773_p7 = pnand %p772_p6, %p766_p3 }
  0x11   :  { %776 = shalt.err (!%p773_p7)
}
  0x12   :  { %20 = dma.hbm_to_vmem [thread:$0]  %s1070_s0, 128, %s18_s13, [#allocation3]  }
  0x13   :  { %s777_s28 = scalar_lea.hbm %s1071_s1, 1024 }
  0x14   :  { %p778_p8 = scmp.ne.s32.totalorder %s1071_s1, %s777_s28  ;;  %p781_p9 = scmp.lt.u32.totalorder %s777_s28, %s1071_s1 }
  0x16   :  { %p783_p10 = pnand %p781_p9, %p778_p8 }
  0x18   :  { %786 = shalt.err (!%p783_p10)
}
  0x19   :  { %s787_s6 = scalar_lea.vmem %s854_s15, 1024  ;;  %p792_p12 = scmp.lt.s32.totalorder %s854_s15, %s854_s15 }
  0x1a   :  { %p788_p11 = scmp.ne.s32.totalorder %s854_s15, %s787_s6  ;;  %p793_p13 = scmp.lt.s32.totalorder %s787_s6, %s787_s6 }
  0x1c   :  { %p794_p0 = por %p793_p13, %p792_p12 }
  0x1e   :  { %p795_p1 = pnand %p794_p0, %p788_p11 }
  0x20   :  { %798 = shalt.err (!%p795_p1)
}
  0x21   :  { %s829_s0 = smov 64   ;;  %s830_s7 = smov 4  }
  0x22   :  { %32 = dma.hbm_to_vmem [thread:$0]  %s1071_s1, 1024, %s854_s15, [#allocation6], %s829_s0, %s829_s0, %s830_s7  }
  0x23   :  { %821 = dma.done.wait [#allocation3], 128  }
  0x24   :  { %822 = vsyncadd [#allocation3], 4294967168 }
  0x25   :  { %823 = dma.done.wait [#allocation6], 1024  }
  0x26   :  { %824 = vsyncadd [#allocation6], 4294966272  ;;  %v831_v0 = vmov 0.0   ;;  %vm832_vm0 = vmmov 0   ;;  %v891_v1 = vld [vmem:[#allocation5] sm:$0xff]   ;;  %v894_v2 = vld [vmem:[#allocation5 + $0x8] sm:$0xff]  }
  0x27   :  { %564 = vmatprep.subr.bf16.mxu0 %v831_v0  ;;  %580 = vmatprep.mubr.msk.bf16.mxu0 %vm832_vm0, %v831_v0  ;;  %v900_v3 = vld [vmem:[#allocation5 + $0x10] sm:$0xff]   ;;  %v906_v4 = vld [vmem:[#allocation5 + $0x18] sm:$0xff]   ;;  %v912_v5 = vld [vmem:[#allocation5 + $0x20] sm:$0xff]  }
  0x28   :  { %584 = vmatprep.subr.bf16.mxu1 %v831_v0  ;;  %600 = vmatprep.mubr.msk.bf16.mxu1 %vm832_vm0, %v831_v0  ;;  %v918_v6 = vld [vmem:[#allocation5 + $0x28] sm:$0xff]   ;;  %v924_v7 = vld [vmem:[#allocation5 + $0x30] sm:$0xff]   ;;  %v930_v8 = vld [vmem:[#allocation5 + $0x38] sm:$0xff]  }
  0x29   :  { %565 = vmatpush3.bf16.msra.mxu0 %v891_v1  ;;  %585 = vmatpush3.bf16.msra.mxu1 %v891_v1  ;;  %v42_v9 = vld [vmem:[#allocation2] sm:$0xff] }
  0x2a   :  { %566 = vmatprep.subr.bf16.mxu0 %v831_v0  ;;  %586 = vmatprep.subr.bf16.mxu1 %v831_v0  ;;  %v60_v10 = vpack.c.bf16 %v42_v9, %v42_v9  ;;  %v960_v11 = vld [vmem:[%s1072_s2] ss:$0 sm:$0xff]  ;;  %s833_s2 = smov [#allocation7]  }
  0x2b   :  { %s473_s11 = sshll.u32 %s833_s2, 4  ;;  %s474_s11 = int_to_ptr.vmem [resolvable:$true] %s473_s11 }
  0x2c   :  { %s799_s12 = scalar_lea.vmem %s474_s11, 128  ;;  %p804_p3 = scmp.lt.s32.totalorder %s474_s11, %s474_s11 }
  0x2d   :  { %567 = vmatpush3.bf16.msra.mxu0 %v894_v2  ;;  %587 = vmatpush3.bf16.msra.mxu1 %v894_v2  ;;  %p800_p2 = scmp.ne.s32.totalorder %s474_s11, %s799_s12  ;;  %p805_p4 = scmp.lt.s32.totalorder %s799_s12, %s799_s12 }
  0x2e   :  { %568 = vmatprep.subr.bf16.mxu0 %v831_v0  ;;  %588 = vmatprep.subr.bf16.mxu1 %v831_v0 }
  0x2f   :  { %p806_p5 = por %p805_p4, %p804_p3 }
  0x31   :  { %569 = vmatpush3.bf16.msra.mxu0 %v900_v3  ;;  %589 = vmatpush3.bf16.msra.mxu1 %v900_v3  ;;  %p807_p6 = pnand %p806_p5, %p800_p2 }
  0x32   :  { %570 = vmatprep.subr.bf16.mxu0 %v831_v0  ;;  %590 = vmatprep.subr.bf16.mxu1 %v831_v0 }
  0x35   :  { %571 = vmatpush3.bf16.msra.mxu0 %v906_v4  ;;  %591 = vmatpush3.bf16.msra.mxu1 %v906_v4 }
  0x36   :  { %572 = vmatprep.subr.bf16.mxu0 %v831_v0  ;;  %592 = vmatprep.subr.bf16.mxu1 %v831_v0 }
  0x39   :  { %573 = vmatpush3.bf16.msra.mxu0 %v912_v5  ;;  %593 = vmatpush3.bf16.msra.mxu1 %v912_v5 }
  0x3a   :  { %574 = vmatprep.subr.bf16.mxu0 %v831_v0  ;;  %594 = vmatprep.subr.bf16.mxu1 %v831_v0 }
  0x3d   :  { %575 = vmatpush3.bf16.msra.mxu0 %v918_v6  ;;  %595 = vmatpush3.bf16.msra.mxu1 %v918_v6 }
  0x3e   :  { %576 = vmatprep.subr.bf16.mxu0 %v831_v0  ;;  %596 = vmatprep.subr.bf16.mxu1 %v831_v0 }
  0x41   :  { %577 = vmatpush3.bf16.msra.mxu0 %v924_v7  ;;  %597 = vmatpush3.bf16.msra.mxu1 %v924_v7 }
  0x42   :  { %578 = vmatprep.subr.bf16.mxu0 %v831_v0  ;;  %598 = vmatprep.subr.bf16.mxu1 %v831_v0 }
  0x45   :  { %579 = vmatpush3.bf16.msra.mxu0 %v930_v8  ;;  %599 = vmatpush3.bf16.msra.mxu1 %v930_v8 }
  0x46   :  { %604 = vmatprep.subr.bf16.mxu0 %v831_v0  ;;  %624 = vmatprep.subr.bf16.mxu1 %v831_v0 }
  0x48   :  { %581 = vmatmul.mubr.bf16.vlgmr.msra.gmra.mrb[0].mxu0 %v60_v10 }
  0x49   :  { %605 = vmatpush3.bf16.msra.mxu0 %v891_v1  ;;  %620 = vmatprep.mubr.msk.bf16.mxu0 %vm832_vm0, %v831_v0 }
  0x4a   :  { %606 = vmatprep.subr.bf16.mxu0 %v831_v0 }
  0x4d   :  { %607 = vmatpush3.bf16.msra.mxu0 %v894_v2 }
  0x4e   :  { %608 = vmatprep.subr.bf16.mxu0 %v831_v0 }
  0x51   :  { %609 = vmatpush3.bf16.msra.mxu0 %v900_v3 }
  0x52   :  { %610 = vmatprep.subr.bf16.mxu0 %v831_v0 }
  0x55   :  { %611 = vmatpush3.bf16.msra.mxu0 %v906_v4 }
  0x56   :  { %612 = vmatprep.subr.bf16.mxu0 %v831_v0 }
  0x59   :  { %613 = vmatpush3.bf16.msra.mxu0 %v912_v5 }
  0x5a   :  { %614 = vmatprep.subr.bf16.mxu0 %v831_v0 }
  0x5d   :  { %615 = vmatpush3.bf16.msra.mxu0 %v918_v6 }
  0x5e   :  { %616 = vmatprep.subr.bf16.mxu0 %v831_v0 }
  0x61   :  { %617 = vmatpush3.bf16.msra.mxu0 %v924_v7 }
  0x62   :  { %618 = vmatprep.subr.bf16.mxu0 %v831_v0 }
  0x65   :  { %619 = vmatpush3.bf16.msra.mxu0 %v930_v8 }
  0x66   :  { %644 = vmatprep.subr.bf16.mxu0 %v831_v0 }
 0x11b   :  { %v149_v12 = vpop.f32.mrb[0].mxu0 }
 0x11c   :  { %v150_v13 = vadd.f32 %v960_v11, %v149_v12  ;;  %v582_v14 = vpop.f32.mrb[1].mxu0 }
 0x11d   :  { %v152_v15 = vpop.f32.mrb[2].mxu0 }
 0x11e   :  { %739 = vtanh.f32 %v150_v13  ;;  %v583_v16 = vpop.f32.mrb[3].mxu0 }
 0x128   :  { %v740_v17 = vpop.eup %739 }
 0x129   :  { %v156_v18 = vmul.f32 0.125, %v740_v17 }
 0x12b   :  { %v157_v19 = vadd.f32 %v156_v18, %v42_v9 }
 0x12d   :  { %v158_v20 = vpack.c.bf16 %v157_v19, %v157_v19 }
 0x12f   :  { %601 = vmatmul.mubr.bf16.vlgmr.msra.gmra.mrb[0].mxu1 %v158_v20 }
 0x130   :  { %625 = vmatpush3.bf16.msra.mxu1 %v891_v1  ;;  %640 = vmatprep.mubr.msk.bf16.mxu1 %vm832_vm0, %v831_v0 }
 0x131   :  { %626 = vmatprep.subr.bf16.mxu1 %v831_v0 }
 0x134   :  { %627 = vmatpush3.bf16.msra.mxu1 %v894_v2 }
 0x135   :  { %628 = vmatprep.subr.bf16.mxu1 %v831_v0 }
 0x138   :  { %629 = vmatpush3.bf16.msra.mxu1 %v900_v3 }
 0x139   :  { %630 = vmatprep.subr.bf16.mxu1 %v831_v0 }
 0x13c   :  { %631 = vmatpush3.bf16.msra.mxu1 %v906_v4 }
 0x13d   :  { %632 = vmatprep.subr.bf16.mxu1 %v831_v0 }
 0x140   :  { %633 = vmatpush3.bf16.msra.mxu1 %v912_v5 }
 0x141   :  { %634 = vmatprep.subr.bf16.mxu1 %v831_v0 }
 0x144   :  { %635 = vmatpush3.bf16.msra.mxu1 %v918_v6 }
 0x145   :  { %636 = vmatprep.subr.bf16.mxu1 %v831_v0 }
 0x148   :  { %637 = vmatpush3.bf16.msra.mxu1 %v924_v7 }
 0x149   :  { %638 = vmatprep.subr.bf16.mxu1 %v831_v0 }
 0x14c   :  { %639 = vmatpush3.bf16.msra.mxu1 %v930_v8 }
 0x14d   :  { %664 = vmatprep.subr.bf16.mxu1 %v831_v0 }
 0x202   :  { %v193_v21 = vpop.f32.mrb[0].mxu1 }
 0x203   :  { %v194_v22 = vadd.f32 %v960_v11, %v193_v21  ;;  %v602_v23 = vpop.f32.mrb[1].mxu1 }
 0x204   :  { %v196_v24 = vpop.f32.mrb[2].mxu1 }
 0x205   :  { %741 = vtanh.f32 %v194_v22  ;;  %v603_v25 = vpop.f32.mrb[3].mxu1 }
 0x20f   :  { %v742_v26 = vpop.eup %741 }
 0x210   :  { %v200_v27 = vmul.f32 0.125, %v742_v26 }
 0x212   :  { %v201_v28 = vadd.f32 %v200_v27, %v157_v19 }
 0x214   :  { %v202_v29 = vpack.c.bf16 %v201_v28, %v201_v28 }
 0x216   :  { %621 = vmatmul.mubr.bf16.vlgmr.msra.gmra.mrb[4].mxu0 %v202_v29 }
 0x217   :  { %645 = vmatpush3.bf16.msra.mxu0 %v891_v1  ;;  %660 = vmatprep.mubr.msk.bf16.mxu0 %vm832_vm0, %v831_v0 }
 0x218   :  { %646 = vmatprep.subr.bf16.mxu0 %v831_v0 }
 0x21b   :  { %647 = vmatpush3.bf16.msra.mxu0 %v894_v2 }
 0x21c   :  { %648 = vmatprep.subr.bf16.mxu0 %v831_v0 }
 0x21f   :  { %649 = vmatpush3.bf16.msra.mxu0 %v900_v3 }
 0x220   :  { %650 = vmatprep.subr.bf16.mxu0 %v831_v0 }
 0x223   :  { %651 = vmatpush3.bf16.msra.mxu0 %v906_v4 }
 0x224   :  { %652 = vmatprep.subr.bf16.mxu0 %v831_v0 }
 0x227   :  { %653 = vmatpush3.bf16.msra.mxu0 %v912_v5 }
 0x228   :  { %654 = vmatprep.subr.bf16.mxu0 %v831_v0 }
 0x22b   :  { %655 = vmatpush3.bf16.msra.mxu0 %v918_v6 }
 0x22c   :  { %656 = vmatprep.subr.bf16.mxu0 %v831_v0 }
 0x22f   :  { %657 = vmatpush3.bf16.msra.mxu0 %v924_v7 }
 0x230   :  { %658 = vmatprep.subr.bf16.mxu0 %v831_v0 }
 0x233   :  { %659 = vmatpush3.bf16.msra.mxu0 %v930_v8 }
 0x234   :  { %684 = vmatprep.subr.bf16.mxu0 %v831_v0 }
 0x2e9   :  { %v237_v30 = vpop.f32.mrb[4].mxu0 }
 0x2ea   :  { %v238_v31 = vadd.f32 %v960_v11, %v237_v30  ;;  %v622_v32 = vpop.f32.mrb[5].mxu0 }
 0x2eb   :  { %v240_v33 = vpop.f32.mrb[6].mxu0 }
 0x2ec   :  { %743 = vtanh.f32 %v238_v31  ;;  %v623_v34 = vpop.f32.mrb[7].mxu0 }
 0x2f6   :  { %v744_v35 = vpop.eup %743 }
 0x2f7   :  { %v244_v36 = vmul.f32 0.125, %v744_v35 }
 0x2f9   :  { %v245_v37 = vadd.f32 %v244_v36, %v201_v28 }
 0x2fb   :  { %v246_v38 = vpack.c.bf16 %v245_v37, %v245_v37 }
 0x2fd   :  { %641 = vmatmul.mubr.bf16.vlgmr.msra.gmra.mrb[4].mxu1 %v246_v38 }
 0x2fe   :  { %665 = vmatpush3.bf16.msra.mxu1 %v891_v1  ;;  %680 = vmatprep.mubr.msk.bf16.mxu1 %vm832_vm0, %v831_v0 }
 0x2ff   :  { %666 = vmatprep.subr.bf16.mxu1 %v831_v0 }
 0x302   :  { %667 = vmatpush3.bf16.msra.mxu1 %v894_v2 }
 0x303   :  { %668 = vmatprep.subr.bf16.mxu1 %v831_v0 }
 0x306   :  { %669 = vmatpush3.bf16.msra.mxu1 %v900_v3 }
 0x307   :  { %670 = vmatprep.subr.bf16.mxu1 %v831_v0 }
 0x30a   :  { %671 = vmatpush3.bf16.msra.mxu1 %v906_v4 }
 0x30b   :  { %672 = vmatprep.subr.bf16.mxu1 %v831_v0 }
 0x30e   :  { %673 = vmatpush3.bf16.msra.mxu1 %v912_v5 }
 0x30f   :  { %674 = vmatprep.subr.bf16.mxu1 %v831_v0 }
 0x312   :  { %675 = vmatpush3.bf16.msra.mxu1 %v918_v6 }
 0x313   :  { %676 = vmatprep.subr.bf16.mxu1 %v831_v0 }
 0x316   :  { %677 = vmatpush3.bf16.msra.mxu1 %v924_v7 }
 0x317   :  { %678 = vmatprep.subr.bf16.mxu1 %v831_v0 }
 0x31a   :  { %679 = vmatpush3.bf16.msra.mxu1 %v930_v8 }
 0x31b   :  { %704 = vmatprep.subr.bf16.mxu1 %v831_v0 }
 0x3d0   :  { %v281_v39 = vpop.f32.mrb[4].mxu1 }
 0x3d1   :  { %v282_v40 = vadd.f32 %v960_v11, %v281_v39  ;;  %v642_v41 = vpop.f32.mrb[5].mxu1 }
 0x3d2   :  { %v284_v42 = vpop.f32.mrb[6].mxu1 }
 0x3d3   :  { %745 = vtanh.f32 %v282_v40  ;;  %v643_v43 = vpop.f32.mrb[7].mxu1 }
 0x3dd   :  { %v746_v44 = vpop.eup %745 }
 0x3de   :  { %v288_v45 = vmul.f32 0.125, %v746_v44 }
 0x3e0   :  { %v289_v46 = vadd.f32 %v288_v45, %v245_v37 }
 0x3e2   :  { %v290_v47 = vpack.c.bf16 %v289_v46, %v289_v46 }
 0x3e4   :  { %661 = vmatmul.mubr.bf16.vlgmr.msra.gmra.mrb[8].mxu0 %v290_v47 }
 0x3e5   :  { %685 = vmatpush3.bf16.msra.mxu0 %v891_v1  ;;  %700 = vmatprep.mubr.msk.bf16.mxu0 %vm832_vm0, %v831_v0 }
 0x3e6   :  { %686 = vmatprep.subr.bf16.mxu0 %v831_v0 }
 0x3e9   :  { %687 = vmatpush3.bf16.msra.mxu0 %v894_v2 }
 0x3ea   :  { %688 = vmatprep.subr.bf16.mxu0 %v831_v0 }
 0x3ed   :  { %689 = vmatpush3.bf16.msra.mxu0 %v900_v3 }
 0x3ee   :  { %690 = vmatprep.subr.bf16.mxu0 %v831_v0 }
 0x3f1   :  { %691 = vmatpush3.bf16.msra.mxu0 %v906_v4 }
 0x3f2   :  { %692 = vmatprep.subr.bf16.mxu0 %v831_v0 }
 0x3f5   :  { %693 = vmatpush3.bf16.msra.mxu0 %v912_v5 }
 0x3f6   :  { %694 = vmatprep.subr.bf16.mxu0 %v831_v0 }
 0x3f9   :  { %695 = vmatpush3.bf16.msra.mxu0 %v918_v6 }
 0x3fa   :  { %696 = vmatprep.subr.bf16.mxu0 %v831_v0 }
 0x3fd   :  { %697 = vmatpush3.bf16.msra.mxu0 %v924_v7 }
 0x3fe   :  { %698 = vmatprep.subr.bf16.mxu0 %v831_v0 }
 0x401   :  { %699 = vmatpush3.bf16.msra.mxu0 %v930_v8 }
 0x4b7   :  { %v325_v48 = vpop.f32.mrb[8].mxu0 }
 0x4b8   :  { %v326_v49 = vadd.f32 %v960_v11, %v325_v48  ;;  %v662_v50 = vpop.f32.mrb[9].mxu0 }
 0x4b9   :  { %v328_v51 = vpop.f32.mrb[10].mxu0 }
 0x4ba   :  { %747 = vtanh.f32 %v326_v49  ;;  %v663_v52 = vpop.f32.mrb[11].mxu0 }
 0x4c4   :  { %v748_v53 = vpop.eup %747 }
 0x4c5   :  { %v332_v54 = vmul.f32 0.125, %v748_v53 }
 0x4c7   :  { %v333_v55 = vadd.f32 %v332_v54, %v289_v46 }
 0x4c9   :  { %v334_v56 = vpack.c.bf16 %v333_v55, %v333_v55 }
 0x4cb   :  { %681 = vmatmul.mubr.bf16.vlgmr.msra.gmra.mrb[8].mxu1 %v334_v56 }
 0x4cc   :  { %705 = vmatpush3.bf16.msra.mxu1 %v891_v1  ;;  %720 = vmatprep.mubr.msk.bf16.mxu1 %vm832_vm0, %v831_v0 }
 0x4cd   :  { %706 = vmatprep.subr.bf16.mxu1 %v831_v0 }
 0x4d0   :  { %707 = vmatpush3.bf16.msra.mxu1 %v894_v2 }
 0x4d1   :  { %708 = vmatprep.subr.bf16.mxu1 %v831_v0 }
 0x4d4   :  { %709 = vmatpush3.bf16.msra.mxu1 %v900_v3 }
 0x4d5   :  { %710 = vmatprep.subr.bf16.mxu1 %v831_v0 }
 0x4d8   :  { %711 = vmatpush3.bf16.msra.mxu1 %v906_v4 }
 0x4d9   :  { %712 = vmatprep.subr.bf16.mxu1 %v831_v0 }
 0x4dc   :  { %713 = vmatpush3.bf16.msra.mxu1 %v912_v5 }
 0x4dd   :  { %714 = vmatprep.subr.bf16.mxu1 %v831_v0 }
 0x4e0   :  { %715 = vmatpush3.bf16.msra.mxu1 %v918_v6 }
 0x4e1   :  { %716 = vmatprep.subr.bf16.mxu1 %v831_v0 }
 0x4e4   :  { %717 = vmatpush3.bf16.msra.mxu1 %v924_v7 }
 0x4e5   :  { %718 = vmatprep.subr.bf16.mxu1 %v831_v0 }
 0x4e8   :  { %719 = vmatpush3.bf16.msra.mxu1 %v930_v8 }
 0x59e   :  { %v369_v57 = vpop.f32.mrb[8].mxu1 }
 0x59f   :  { %v370_v58 = vadd.f32 %v960_v11, %v369_v57  ;;  %v682_v59 = vpop.f32.mrb[9].mxu1 }
 0x5a0   :  { %v372_v60 = vpop.f32.mrb[10].mxu1 }
 0x5a1   :  { %749 = vtanh.f32 %v370_v58  ;;  %v683_v61 = vpop.f32.mrb[11].mxu1 }
 0x5ab   :  { %v750_v62 = vpop.eup %749 }
 0x5ac   :  { %v376_v63 = vmul.f32 0.125, %v750_v62 }
 0x5ae   :  { %v377_v1 = vadd.f32 %v376_v63, %v333_v55 }
 0x5b0   :  { %v378_v2 = vpack.c.bf16 %v377_v1, %v377_v1 }
 0x5b2   :  { %701 = vmatmul.mubr.bf16.vlgmr.msra.gmra.mrb[12].mxu0 %v378_v2 }
 0x685   :  { %v413_v3 = vpop.f32.mrb[12].mxu0 }
 0x686   :  { %v414_v4 = vadd.f32 %v960_v11, %v413_v3  ;;  %v702_v5 = vpop.f32.mrb[13].mxu0 }
 0x687   :  { %v416_v6 = vpop.f32.mrb[14].mxu0 }
 0x688   :  { %751 = vtanh.f32 %v414_v4  ;;  %v703_v0 = vpop.f32.mrb[15].mxu0 }
 0x692   :  { %v752_v7 = vpop.eup %751 }
 0x693   :  { %v420_v8 = vmul.f32 0.125, %v752_v7 }
 0x695   :  { %v421_v9 = vadd.f32 %v420_v8, %v377_v1 }
 0x697   :  { %v422_v10 = vpack.c.bf16 %v421_v9, %v421_v9 }
 0x699   :  { %721 = vmatmul.mubr.bf16.vlgmr.msra.gmra.mrb[12].mxu1 %v422_v10 }
 0x76c   :  { %v457_v12 = vpop.f32.mrb[12].mxu1 }
 0x76d   :  { %v458_v13 = vadd.f32 %v960_v11, %v457_v12  ;;  %v722_v14 = vpop.f32.mrb[13].mxu1 }
 0x76e   :  { %v460_v15 = vpop.f32.mrb[14].mxu1 }
 0x76f   :  { %753 = vtanh.f32 %v458_v13  ;;  %v723_v16 = vpop.f32.mrb[15].mxu1 }
 0x779   :  { %v754_v17 = vpop.eup %753 }
 0x77a   :  { %v464_v18 = vmul.f32 0.125, %v754_v17 }
 0x77c   :  { %v465_v19 = vadd.f32 %v464_v18, %v421_v9 }
 0x77e   :  { %466 = vst [vmem:[#allocation7] sm:$0xff] %v465_v19 }
 0x77f   :  { %810 = shalt.err (!%p807_p6)
}
 0x780   :  { %s811_s15 = scalar_lea.hbm %s1073_s3, 128 }
 0x781   :  { %p812_p7 = scmp.ne.s32.totalorder %s1073_s3, %s811_s15  ;;  %p815_p8 = scmp.lt.u32.totalorder %s811_s15, %s1073_s3 }
 0x783   :  { %p817_p9 = pnand %p815_p8, %p812_p7 }
 0x785   :  { %820 = shalt.err (!%p817_p9)
}
 0x786   :  { %476 = dma.vmem_to_hbm [thread:$0]  %s474_s11, 128, %s1073_s3, [#allocation4]  }
 0x787   :  { %825 = dma.done.wait [#allocation4], 128  }
 0x788   :  { %826 = vsyncadd [#allocation4], 4294967168 }
 0x789   :  { %480 = vsyncpa [#allocation3], 1 }
 0x78a   :  { %481 = vsyncpa [#allocation6], 1 }
 0x78b   :  { %482 = vsyncpa [#allocation4], 1 }

</bundles_post_ra>
